<compile_context>
chip_gen: v6e
topology: v6e:2x2x1
jax: 0.10.0
libtpu: 0.0.40
codegen_flags: <defaults>
</compile_context>

<pallas_src>
import math

import jax
import jax.numpy as jnp
from jax import lax
from jax.experimental import pallas as pl
from jax.experimental.pallas import tpu as pltpu

# Small, module-consistent toy shapes (module defaults are n_embd=512, block_size=256).
N_EMBD = 32       # C
HEAD_SIZE = 16    # H
SEQ = 8           # T (<= block_size)
BATCH = 2         # B


def head_kernel(x_ref, w_ref, o_ref):
    """One batch element of causal single-head attention.

    x_ref: (T, C)     activation tile for this grid step (original dtype)
    w_ref: (3, C, H)  [Wq, Wk, Wv] stacked on the leading axis, matmul dtype,
                      VMEM-resident across the whole grid
    o_ref: (T, H)     output tile (original dtype)
    """
    T, C = x_ref.shape
    _, _, H = w_ref.shape
    mm_dtype = w_ref.dtype

    # Cast after the VMEM load (no wrapper-side HBM cast pass).
    x = x_ref[...].astype(mm_dtype)                                  # (T, C)

    # QKV projections: leading-axis weight slices are contiguous blocks
    # (no non-128-aligned lane slicing).  f32 accumulation on the MXU.
    q = jnp.dot(x, w_ref[0], preferred_element_type=jnp.float32)     # (T, H) f32
    k = jnp.dot(x, w_ref[1], preferred_element_type=jnp.float32)     # (T, H) f32
    v = jnp.dot(x, w_ref[2], preferred_element_type=jnp.float32)     # (T, H) f32

    # Apply 1/sqrt(H) to q (T,H) rather than to wei (T,T): fewer VPU multiplies.
    q = (q * jnp.float32(1.0 / math.sqrt(H))).astype(mm_dtype)
    k = k.astype(mm_dtype)
    v = v.astype(mm_dtype)

    # q @ k^T: contract the H axes directly — no explicit transpose of k.
    wei = lax.dot_general(
        q, k,
        dimension_numbers=(((1,), (1,)), ((), ())),
        preferred_element_type=jnp.float32)                          # (T, T) f32

    # Causal (tril) mask: col > row -> -inf.  Diagonal kept, so no 0/0 rows.
    row = lax.broadcasted_iota(jnp.int32, (T, T), 0)
    col = lax.broadcasted_iota(jnp.int32, (T, T), 1)
    wei = jnp.where(col <= row, wei, jnp.float32(-jnp.inf))

    # Softmax in f32; denominator reciprocal routed to the EUP (approx=True).
    m = jnp.max(wei, axis=-1, keepdims=True)
    e = jnp.exp(wei - m)
    s = jnp.sum(e, axis=-1, keepdims=True)
    p = e * pl.reciprocal(s, approx=True)                            # (T, T) f32

    # Dropout: eval-mode identity.
    # TODO(synk): training-mode nn.Dropout uses torch RNG and cannot be matched
    #             bit-exactly; this kernel implements the eval-mode forward.

    # p @ v, f32 accumulation.
    out = jnp.dot(p.astype(mm_dtype), v,
                  preferred_element_type=jnp.float32)                # (T, H) f32
    o_ref[...] = out.astype(o_ref.dtype)


def head_forward(x, w_qkv, *, matmul_dtype=jnp.bfloat16):
    """x: (B, T, C) in its native dtype; w_qkv: (3, C, H) = stacked [Wq, Wk, Wv]
    (each already transposed to (C, H))."""
    B, T, C = x.shape
    three, c2, H = w_qkv.shape
    assert three == 3 and c2 == C
    # Weight is tiny (3*C*H); cast it once here so the resident VMEM copy is
    # already in the MXU operand dtype.  Activations are NOT cast here (that
    # would be a full extra HBM pass) — the kernel casts after the VMEM load.
    w = w_qkv.astype(matmul_dtype)
    return pl.pallas_call(
        head_kernel,
        out_shape=jax.ShapeDtypeStruct((B, T, H), x.dtype),
        grid=(B,),
        in_specs=[
            # One (T, C) activation tile per grid step; auto double-buffered.
            pl.BlockSpec((None, T, C), lambda b: (b, 0, 0)),
            # Fused QKV weight: same block every step -> resident in VMEM.
            pl.BlockSpec((3, C, H), lambda b: (0, 0, 0)),
        ],
        out_specs=pl.BlockSpec((None, T, H), lambda b: (b, 0, 0)),
        compiler_params=pltpu.CompilerParams(
            dimension_semantics=("parallel",)),
    )(x, w)


def reference_forward(x, wk, wq, wv):
    # Pure-JAX f32 reference mirroring the PyTorch module (eval mode).
    k = x @ wk
    q = x @ wq
    v = x @ wv
    wei = (q @ jnp.swapaxes(k, -2, -1)) * (k.shape[-1] ** -0.5)
    T = x.shape[1]
    tril = jnp.tril(jnp.ones((T, T), dtype=bool))
    wei = jnp.where(tril, wei, -jnp.inf)
    wei = jax.nn.softmax(wei, axis=-1)
    return wei @ v


if __name__ == "__main__":
    key = jax.random.PRNGKey(0)
    kx, kk, kq, kv = jax.random.split(key, 4)

    x = jax.random.normal(kx, (BATCH, SEQ, N_EMBD), dtype=jnp.float32)
    # nn.Linear weight is (H, C); store transposed as (C, H). Init ~ U(-1/sqrt(C), 1/sqrt(C)).
    bound = 1.0 / math.sqrt(N_EMBD)
    wk = jax.random.uniform(kk, (N_EMBD, HEAD_SIZE), jnp.float32, -bound, bound)
    wq = jax.random.uniform(kq, (N_EMBD, HEAD_SIZE), jnp.float32, -bound, bound)
    wv = jax.random.uniform(kv, (N_EMBD, HEAD_SIZE), jnp.float32, -bound, bound)
    w_qkv = jnp.stack([wq, wk, wv], axis=0)                          # (3, C, H)

    ref = reference_forward(x, wk, wq, wv)

    # f32-operand path (exact MXU inputs); slack only for the approx reciprocal.
    out_f32 = head_forward(x, w_qkv, matmul_dtype=jnp.float32)
    jax.block_until_ready(out_f32)
    assert out_f32.shape == (BATCH, SEQ, HEAD_SIZE)
    assert jnp.allclose(out_f32, ref, atol=5e-3, rtol=5e-3), "f32 path mismatch"

    # bf16-operand path (v6e/v7x MXU peak-rate config), f32 accumulate + f32 softmax.
    out_bf16 = head_forward(x, w_qkv, matmul_dtype=jnp.bfloat16)
    jax.block_until_ready(out_bf16)
    assert out_bf16.shape == (BATCH, SEQ, HEAD_SIZE)
    assert jnp.allclose(out_bf16, ref, atol=5e-2, rtol=5e-2), "bf16 path mismatch"

    print("KERNEL_OK")
</pallas_src>

<mosaic_0001>
module attributes {stable_mosaic.version = 11 : i64} {
  func.func @head_kernel(%arg0: i32, %arg1: memref<1x8x32xf32, #tpu.memory_space<vmem>>, %arg2: memref<3x32x16xf32, #tpu.memory_space<vmem>>, %arg3: memref<1x8x16xf32, #tpu.memory_space<vmem>>) attributes {dimension_semantics = [#tpu.dimension_semantics<parallel>], iteration_bounds = array<i64: 2>, scalar_prefetch = 0 : i64, scratch_operands = 0 : i64, tpu.core_type = #tpu.core_type<tc>, window_params = [{transform_indices = @transform_0, window_bounds = array<i64: 1, 8, 32>}, {pipeline_mode = #tpu.pipeline_mode<synchronous>, transform_indices = @transform_1, window_bounds = array<i64: 3, 32, 16>}, {transform_indices = @transform_2, window_bounds = array<i64: 1, 8, 16>}]} {
    %c0 = arith.constant 0 : index
    %c0_0 = arith.constant 0 : index
    %c0_1 = arith.constant 0 : index
    %0 = vector.load %arg1[%c0, %c0_0, %c0_1] : memref<1x8x32xf32, #tpu.memory_space<vmem>>, vector<1x8x32xf32>
    %1 = vector.shape_cast %0 : vector<1x8x32xf32> to vector<8x32xf32>
    %c0_2 = arith.constant 0 : index
    %c0_3 = arith.constant 0 : index
    %c0_4 = arith.constant 0 : index
    %2 = vector.load %arg2[%c0_2, %c0_3, %c0_4] : memref<3x32x16xf32, #tpu.memory_space<vmem>>, vector<1x32x16xf32>
    %3 = vector.shape_cast %2 : vector<1x32x16xf32> to vector<32x16xf32>
    %cst = arith.constant dense<0.000000e+00> : vector<8x16xf32>
    %4 = tpu.matmul %1, %3, %cst {dimension_numbers = #tpu.dot_dimension_numbers<[1], [0], [0], [1], [0, 0, 1, 1], [], []>} : vector<8x32xf32>, vector<32x16xf32>, vector<8x16xf32> -> vector<8x16xf32>
    %c1 = arith.constant 1 : index
    %c0_5 = arith.constant 0 : index
    %c0_6 = arith.constant 0 : index
    %5 = vector.load %arg2[%c1, %c0_5, %c0_6] : memref<3x32x16xf32, #tpu.memory_space<vmem>>, vector<1x32x16xf32>
    %6 = vector.shape_cast %5 : vector<1x32x16xf32> to vector<32x16xf32>
    %cst_7 = arith.constant dense<0.000000e+00> : vector<8x16xf32>
    %7 = tpu.matmul %1, %6, %cst_7 {dimension_numbers = #tpu.dot_dimension_numbers<[1], [0], [0], [1], [0, 0, 1, 1], [], []>} : vector<8x32xf32>, vector<32x16xf32>, vector<8x16xf32> -> vector<8x16xf32>
    %c2 = arith.constant 2 : index
    %c0_8 = arith.constant 0 : index
    %c0_9 = arith.constant 0 : index
    %8 = vector.load %arg2[%c2, %c0_8, %c0_9] : memref<3x32x16xf32, #tpu.memory_space<vmem>>, vector<1x32x16xf32>
    %9 = vector.shape_cast %8 : vector<1x32x16xf32> to vector<32x16xf32>
    %cst_10 = arith.constant dense<0.000000e+00> : vector<8x16xf32>
    %10 = tpu.matmul %1, %9, %cst_10 {dimension_numbers = #tpu.dot_dimension_numbers<[1], [0], [0], [1], [0, 0, 1, 1], [], []>} : vector<8x32xf32>, vector<32x16xf32>, vector<8x16xf32> -> vector<8x16xf32>
    %cst_11 = arith.constant 2.500000e-01 : f32
    %11 = vector.broadcast %cst_11 : f32 to vector<8x16xf32>
    %12 = arith.mulf %4, %11 : vector<8x16xf32>
    %cst_12 = arith.constant dense<0.000000e+00> : vector<8x8xf32>
    %13 = tpu.matmul %12, %7, %cst_12 {dimension_numbers = #tpu.dot_dimension_numbers<[1], [1], [0], [0], [0, 0, 1, 0], [], []>} : vector<8x16xf32>, vector<8x16xf32>, vector<8x8xf32> -> vector<8x8xf32>
    %14 = tpu.iota {dimensions = array<i32: 0>} : vector<8x8xi32>
    %15 = tpu.iota {dimensions = array<i32: 1>} : vector<8x8xi32>
    %16 = arith.cmpi sle, %15, %14 : vector<8x8xi32>
    %cst_13 = arith.constant 0xFF800000 : f32
    %17 = vector.broadcast %cst_13 : f32 to vector<8x8xf32>
    %18 = arith.select %16, %13, %17 : vector<8x8xi1>, vector<8x8xf32>
    %cst_14 = arith.constant dense<0xFF800000> : vector<8xf32>
    %19 = vector.multi_reduction <maximumf>, %18, %cst_14 [1] : vector<8x8xf32> to vector<8xf32>
    %20 = vector.shape_cast %19 : vector<8xf32> to vector<8x1xf32>
    %21 = vector.broadcast %20 : vector<8x1xf32> to vector<8x8xf32>
    %22 = arith.subf %18, %21 : vector<8x8xf32>
    %23 = math.exp %22 : vector<8x8xf32>
    %cst_15 = arith.constant dense<0.000000e+00> : vector<8xf32>
    %24 = vector.multi_reduction <add>, %23, %cst_15 [1] : vector<8x8xf32> to vector<8xf32>
    %25 = vector.shape_cast %24 : vector<8xf32> to vector<8x1xf32>
    %26 = tpu.reciprocal %25 {approx = true} : vector<8x1xf32> -> vector<8x1xf32>
    %27 = vector.broadcast %26 : vector<8x1xf32> to vector<8x8xf32>
    %28 = arith.mulf %23, %27 : vector<8x8xf32>
    %cst_16 = arith.constant dense<0.000000e+00> : vector<8x16xf32>
    %29 = tpu.matmul %28, %10, %cst_16 {dimension_numbers = #tpu.dot_dimension_numbers<[1], [0], [0], [1], [0, 0, 1, 1], [], []>} : vector<8x8xf32>, vector<8x16xf32>, vector<8x16xf32> -> vector<8x16xf32>
    %c0_17 = arith.constant 0 : index
    %c0_18 = arith.constant 0 : index
    %c0_19 = arith.constant 0 : index
    %30 = vector.load %arg3[%c0_17, %c0_18, %c0_19] : memref<1x8x16xf32, #tpu.memory_space<vmem>>, vector<1x8x16xf32>
    %31 = vector.shape_cast %30 : vector<1x8x16xf32> to vector<8x16xf32>
    %32 = vector.shape_cast %29 : vector<8x16xf32> to vector<1x8x16xf32>
    tpu.vector_store %arg3[%c0_17, %c0_18, %c0_19], %32 {strides = array<i32>} : memref<1x8x16xf32, #tpu.memory_space<vmem>>, vector<1x8x16xf32>,
    return
  }
  func.func @transform_0(%arg0: i32) -> (i32, i32, i32) {
    %c0_i32 = arith.constant 0 : i32
    %c0_i32_0 = arith.constant 0 : i32
    %c0_i32_1 = arith.constant 0 : i32
    return %arg0, %c0_i32, %c0_i32_0 : i32, i32, i32
  }
  func.func @transform_1(%arg0: i32) -> (i32, i32, i32) {
    %c0_i32 = arith.constant 0 : i32
    %c0_i32_0 = arith.constant 0 : i32
    %c0_i32_1 = arith.constant 0 : i32
    %c0_i32_2 = arith.constant 0 : i32
    return %c0_i32, %c0_i32_0, %c0_i32_1 : i32, i32, i32
  }
  func.func @transform_2(%arg0: i32) -> (i32, i32, i32) {
    %c0_i32 = arith.constant 0 : i32
    %c0_i32_0 = arith.constant 0 : i32
    %c0_i32_1 = arith.constant 0 : i32
    return %arg0, %c0_i32, %c0_i32_0 : i32, i32, i32
  }
}

</mosaic_0001>

<bundles_post_ra>
// kernel: tpu_custom_call.1
= control target key start
LH: loop header
LB: loop body
LE: loop exit
PB: predicated region body
PF: predicated region fallthrough
CT: control target
= control target key end

     0   :  { %7 = vsyncpa [#allocation3], 0  ;;  %s971_s0 = inlined_call_operand.vmem [shape: f32[2,8,32], index: 0, kind: input, shape index: {}]   ;;  %s972_s1 = inlined_call_operand.vmem [shape: f32[3,32,16], index: 1, kind: input, shape index: {}]   ;;  %s973_s2 = inlined_call_operand.hbm [shape: f32[2,8,16], index: 2, kind: output, shape index: {}]  }
   0x1   :  { %9 = vsyncpa [#allocation3 + $0x1], 0  ;;  %s822_s9 = smov 0   ;;  %s824_s10 = smov 0  }
   0x2   :  { %s826_s11 = smov 0   ;;  %s828_s12 = smov 0  }
   0x3 LB: > { %s843_s13 = sadd.s32 4294967295, %s802_s12   ;;  %s611_s14 = sadd.s32 4294967294, %s802_s12   ;;  %s802_s12 = sphi %s828_s12, %s979_s12   ;;  %s798_s11 = sphi %s826_s11, %s978_s11   ;;  %s794_s10 = sphi %s824_s10, %s977_s10   ;;  %s790_s9 = sphi %s822_s9, %s976_s9  }
   0x4   : > { %s847_s15 = sadd.s32 1, %s802_s12   ;;  %s69_s16 = sadd.s32 1, %s798_s11 }
   0x5   : > { %s66_s17 = ssub.s32 %s802_s12, %s847_s15  ;;  %p79_p0 = scmp.ne.s32.totalorder %s798_s11, %s794_s10 }
   0x6   : > { %p67_p1 = scmp.eq.s32.totalorder %s66_s17, 0  ;;  %p80_p2 = scmp.eq.s32.totalorder %s843_s13, 1 }
   0x7   : > { %p85_p3 = scmp.ne.s32.totalorder %s794_s10, %s790_s9  ;;  %p86_p4 = scmp.eq.s32.totalorder %s611_s14, 1 }
   0x8   : > { %s858_s18 = scalar_select %p67_p1, %s798_s11, %s69_s16  }
   0x9   : > { %p860_p5 = por %p80_p2, %p79_p0  ;;  %p864_p6 = por %p86_p4, %p85_p3 }
   0xa   : > { %p614_p7 = scmp.ge.s32.totalorder %s802_s12, 1  ;;  %p114_p8 = scmp.lt.s32.totalorder %s802_s12, 3 }
   0xc   : > { %p115_p9 = pnand %p614_p7, %p114_p8 }
   0xd   : > { %p135_p10 = scmp.lt.s32.totalorder (!%p115_p9), %s843_s13, 1  ;;  %s132_s3 = sand.u32 (!%p115_p9), 1, %s794_s10  }
   0xe   : > { %118 = sbr.rel (%p115_p9) target bundleno = 938 (0x3aa), region = 28  ;;  %s615_s4 = sshll.u32 (!%p115_p9), %s132_s3, 3 }
   0xf   : > { %s632_s5 = sshll.u32 (!%p115_p9), %s843_s13, 7 }
  0x10   : > { %s929_s16 = scalar_lea.hbm (!%p115_p9), %s973_s2, %s632_s5 }
  0x13   : > { %v143_v0 = vld [vmem:[%s972_s1 + $0x18] sm:$0xff]  ;;  %v804_v2 = vmov 0.0   ;;  %v142_v3 = vld [vmem:[%s972_s1 + $0x10] sm:$0xff]  ;;  %s136_s29 = scalar_select %p135_p10, %s843_s13, 1  ;;  %v141_v5 = vld [vmem:[%s972_s1 + $0x8] sm:$0xff]  ;;  %vm144_vm0 = vcmask 261120   ;;  %v446_v19 = vlaneseq }
  0x14   : > { %v621_v1 = vld [vmem:[%s972_s1 + $0x38] sm:$0xff]  ;;  %654 = vmatprep.subr.mxu0 %v804_v2  ;;  %665 = vmatprep.subr.mxu1 %v804_v2  ;;  %v620_v4 = vld [vmem:[%s972_s1 + $0x30] sm:$0xff]  ;;  %v619_v6 = vld [vmem:[%s972_s1 + $0x28] sm:$0xff]  ;;  %vm805_vm1 = vmmov 0   ;;  %vm369_vm2 = vcmask 130048   ;;  %vm452_vm4 = vcmask 64512  }
  0x15   : > { %655 = vmatpush3.msra.mxu0 %v143_v0  ;;  %666 = vmatpush3.msra.mxu1 %v621_v1  ;;  %s616_s6 = sshll.u32 %s136_s29, 3  ;;  %v140_v7 = vld [vmem:[%s972_s1] sm:$0xff]  ;;  %v626_v15 = vld [vmem:[%s972_s1 + $0x58] sm:$0xff]  ;;  %v625_v16 = vld [vmem:[%s972_s1 + $0x50] sm:$0xff]  ;;  %v447_v20 = vshrl.u32 %v446_v19, 7  ;;  %v449_v21 = vand.u32 127, %v446_v19 }
  0x16   : > { %656 = vmatprep.subr.mxu0 %v804_v2  ;;  %667 = vmatprep.subr.mxu1 %v804_v2  ;;  %s138_s17 = scalar_lea.vmem %s971_s0, %s616_s6  ;;  %v618_v8 = vld [vmem:[%s972_s1 + $0x20] sm:$0xff]  ;;  %v624_v17 = vld [vmem:[%s972_s1 + $0x48] sm:$0xff]  ;;  %s134_s6 = scalar_lea.vmem [#allocation2], %s615_s4 }
  0x17   : > { %657 = vmatpush3.msra.mxu0 %v142_v3  ;;  %668 = vmatpush3.msra.mxu1 %v620_v4  ;;  %v139_v9 = vld [vmem:[%s138_s17] sm:$0xff]  ;;  %vm450_vm3 = vcmp.le.s32.totalorder %v449_v21, %v447_v20  ;;  %s552_s7 = sshll.u32 %s134_s6, 4  ;;  %s539_s17 = scalar_lea.sflag [#allocation3], %s132_s3  ;;  %s931_s7 = int_to_ptr.vmem [resolvable:$true] %s552_s7 }
  0x18   : > { %658 = vmatprep.subr.mxu0 %v804_v2  ;;  %669 = vmatprep.subr.mxu1 %v804_v2  ;;  %v623_v18 = vld [vmem:[%s972_s1 + $0x40] sm:$0xff]  ;;  %s742_s21 = scalar_lea.vmem %s931_s7, 128  ;;  %s806_s13 = smov [#allocation2]  }
  0x19   : > { %659 = vmatpush3.msra.mxu0 %v141_v5  ;;  %670 = vmatpush3.msra.mxu1 %v619_v6  ;;  %p743_p11 = scmp.ne.s32.totalorder %s931_s7, %s742_s21  ;;  %s746_s22 = sshll.u32 %s806_s13, 4  ;;  %s747_s22 = int_to_ptr.vmem [resolvable:$false] %s746_s22 }
  0x1a   : > { %660 = vmatprep.subr.mxu0 %v804_v2  ;;  %671 = vmatprep.subr.mxu1 %v804_v2  ;;  %s748_s23 = scalar_lea.vmem %s747_s22, 256  ;;  %p749_p0 = scmp.lt.s32.totalorder %s931_s7, %s747_s22 }
  0x1b   : > { %661 = vmatpush3.msra.mxu0 %v140_v7  ;;  %662 = vmatprep.mubr.msk.f32.mxu0 %vm805_vm1, %v804_v2  ;;  %p744_p12 = pnand %p743_p11, %p860_p5  ;;  %p750_p1 = scmp.lt.s32.totalorder %s748_s23, %s742_s21 }
  0x1c   : > { %672 = vmatpush3.msra.mxu1 %v618_v8  ;;  %673 = vmatprep.mubr.msk.f32.mxu1 %vm805_vm1, %v804_v2 }
  0x1d   : > { %663 = vmatmul.mubr.msk.f32.vlgmr.msra.gmra.mxu0 %vm144_vm0, %v139_v9  ;;  %674 = vmatmul.mubr.msk.f32.vlgmr.msra.gmra.mxu1 %vm144_vm0, %v139_v9  ;;  %p745_p13 = pneg %p744_p12  ;;  %p751_p2 = por %p750_p1, %p749_p0 }
  0x1e   : > { %687 = vmatprep.subr.mxu1 %v804_v2  ;;  %689 = vmatprep.mubr.msk.f32.mxu1 %vm805_vm1, %v804_v2 }
  0x1f   : > { %676 = vmatprep.subr.mxu0 %v804_v2  ;;  %684 = vmatprep.mubr.msk.f32.mxu0 %vm805_vm1, %v804_v2  ;;  %p752_p3 = pnand %p751_p2, %p745_p13 }
  0x20   : > { %677 = vmatpush3.msra.mxu0 %v626_v15 }
  0x21   : > { %678 = vmatprep.subr.mxu0 %v804_v2 }
  0x22   : > { %679 = vmatpush3.msra.mxu0 %v625_v16 }
  0x23   : > { %680 = vmatprep.subr.mxu0 %v804_v2 }
  0x24   : > { %681 = vmatpush3.msra.mxu0 %v624_v17 }
  0x25   : > { %682 = vmatprep.subr.mxu0 %v804_v2 }
  0x26   : > { %683 = vmatpush3.msra.mxu0 %v623_v18 }
  0x27   : > { %685 = vmatmul.mubr.msk.f32.vlgmr.msra.gmra.mxu0 %vm144_vm0, %v139_v9 }
  0xdd   : > { %v214_v10 = vpop.f32.mrf.mxu0  ;;  %v289_v11 = vpop.f32.mrf.mxu1 }
  0xde   : > { %v368_v12 = vmul.f32 0.25, %v214_v10  ;;  %688 = vmatpush3.xpose.msk.msra.mxu1 %vm369_vm2, %v289_v11 }
  0xdf   : > { %v664_v13 = vpop.f32.mrf.mxu0  ;;  %v675_v14 = vpop.f32.mrf.mxu1  ;;  %692 = vmatprep.subr.mxu1 %v804_v2 }
  0xe1   : > { %690 = vmatmul.mubr.msk.f32.vlgmr.msra.gmra.mxu1 %vm369_vm2, %v368_v12 }
  0xe2   : > { %694 = vmatprep.mubr.msk.f32.mxu1 %vm805_vm1, %v804_v2 }
  0xe7   : > { %v364_v31 = vpop.f32.mrf.mxu0 }
  0xe8   : > { %693 = vmatpush3.msra.mxu1 %v364_v31 }
  0xe9   : > { %v686_v32 = vpop.f32.mrf.mxu0 }
 0x1a1   : > { %v442_v22 = vpop.f32.mrf.mxu1 }
 0x1a2   : > { %v451_v23 = vsel %vm450_vm3, %v442_v22, -inf }
 0x1a3   : > { %v691_v24 = vpop.f32.mrf.mxu1  ;;  %v453_v25 = vsel %vm452_vm4, %v451_v23, -inf }
 0x1a4   : > { %454 = vmax.xlane.f32.xlu0 %v453_v25 }
 0x22d   : > { %v455_v26 = vpop.xlane.xlu0 %454 }
 0x22e   : > { %v456_v27 = vsub.f32 %v451_v23, %v455_v26 }
 0x230   : > { %v457_v28 = vmul.f32 1.442695, %v456_v27 }
 0x232   : > { %738 = vpow2.f32 %v457_v28 }
 0x23f   : > { %v739_v29 = vpop.eup %738 }
 0x240   : > { %v459_v30 = vsel %vm452_vm4, %v739_v29, 0.0 }
 0x241   : > { %460 = vadd.xlane.f32.xlu0 %v459_v30 }
 0x2ca   : > { %v461_v33 = vpop.xlane.xlu0 %460 }
 0x2cb   : > { %740 = vrcp.f32 %v461_v33 }
 0x2d8   : > { %v741_v34 = vpop.eup %740 }
 0x2d9   : > { %v463_v35 = vmul.f32 %v741_v34, %v739_v29 }
 0x2db   : > { %695 = vmatmul.mubr.msk.f32.vlgmr.msra.gmra.mxu1 %vm452_vm4, %v463_v35 }
 0x39b   : > { %v533_v36 = vpop.f32.mrf.mxu1 }
 0x39c   : > { %537 = vst.msk [vmem:[%s134_s6] sm:$0xff] %vm369_vm2, %v533_v36 }
 0x39d   : > { %v696_v37 = vpop.f32.mrf.mxu1 }
 0x39e   : > { %755 = shalt.err (!%p752_p3)
}
 0x39f   : > { %s756_s24 = scalar_lea.hbm %s929_s16, 128  ;;  %s760_s27 = scalar_lea.hbm %s973_s2, 256 }
 0x3a0   : > { %p757_p4 = scmp.ne.s32.totalorder %s929_s16, %s756_s24  ;;  %p761_p9 = scmp.lt.s32.totalorder %s929_s16, %s973_s2 }
 0x3a1   : > { %p762_p10 = scmp.lt.s32.totalorder %s760_s27, %s756_s24 }
 0x3a2   : > { %p758_p7 = pnand %p757_p4, %p860_p5 }
 0x3a3   : > { %p763_p11 = por %p762_p10, %p761_p9 }
 0x3a4   : > { %p759_p8 = pneg %p758_p7 }
 0x3a6   : > { %p764_p12 = pnand %p763_p11, %p759_p8 }
 0x3a8   : > { %767 = shalt.err (!%p764_p12)
}
 0x3a9   : > { %697 = dma.vmem_to_hbm [thread:$0]  (%p860_p5), %s931_s7, 128, %s929_s16, %s539_s17  }
 0x3aa PF: > { %p703_p13 = scmp.ge.s32.totalorder %s802_s12, 2  ;;  %s564_s30 = sand.u32 1, %s790_s9  }
 0x3ab   : > { %s565_s3 = scalar_lea.sflag [#allocation3], %s564_s30 }
 0x3ac   : > { %p700_p0 = pnand %p703_p13, %p864_p6 }
 0x3ae   : > { %p701_p1 = pneg %p700_p0 }
 0x3b0   : > { %785 = dma.done.wait (%p701_p1), %s565_s3, 128  }
 0x3b1   : > { %787 = vsyncadd (%p701_p1), %s565_s3, 4294967168  ;;  %p12_p2 = scmp.ge.s32.totalorder %s847_s15, 4   ;;  %s976_s9 = smov %s794_s10 }
 0x3b2   : > { %s977_s10 = smov %s798_s11  ;;  %s978_s11 = smov %s858_s18 }
 0x3b3   : > { %s979_s12 = smov %s847_s15  ;;  %14 = sbr.rel (!%p12_p2) target bundleno = 3 (0x3), region = 65 }
 0x3b8   :  { %570 = vsyncpa [#allocation3], 1 }
 0x3b9   :  { %572 = vsyncpa [#allocation3 + $0x1], 1 }

</bundles_post_ra>
